<compile_context>
chip_gen: v7x
topology: tpu7x:2x2x1
jax: 0.10.0
libtpu: 0.0.40
codegen_flags: <defaults>
</compile_context>

<pallas_src>
import functools

import jax
import jax.numpy as jnp
from jax import lax
from jax.experimental import pallas as pl
from jax.experimental.pallas import tpu as pltpu


def _round_up(x, m):
    return ((x + m - 1) // m) * m


def _default_num_splits():
    # v7x has 2 TensorCores per chip; on v5e/v6e a "parallel" split only adds
    # writeback + a wrapper-side sum, so default to 1 there.
    try:
        kind = jax.devices()[0].device_kind.lower()
    except Exception:  # pragma: no cover - defensive
        return 1
    return 2 if ("v7" in kind or "7x" in kind) else 1


def _polarization_kernel(n_ref, r_ref, q_ref, b_ref,
                         qr_ref, rs_ref, qs_ref, *,
                         tiles_per_split, tile_n, chunk, num_graphs, use_onehot):
    s = pl.program_id(0)
    t = pl.program_id(1)
    g_pad = qr_ref.shape[1]

    @pl.when(t == 0)
    def _init():
        qr_ref[...] = jnp.zeros_like(qr_ref)
        rs_ref[...] = jnp.zeros_like(rs_ref)
        qs_ref[...] = jnp.zeros_like(qs_ref)

    n = n_ref[0]                                           # true node count (SMEM)
    tile_start = (s * tiles_per_split + t) * tile_n        # unclamped global offset

    # tile/loop-invariant iotas, built once per grid step (JAX does not CSE these).
    lane = lax.broadcasted_iota(jnp.int32, (1, chunk), 1)
    if use_onehot:
        graph_ids = lax.broadcasted_iota(jnp.int32, (g_pad, chunk), 0)
    else:
        gid3 = lax.broadcasted_iota(jnp.int32, (3, g_pad), 1)
        gid1 = lax.broadcasted_iota(jnp.int32, (1, g_pad), 1)

    def body(c, carry):
        acc_qr, acc_r, acc_q = carry
        off = pl.multiple_of(c * chunk, chunk)
        r = r_ref[:, pl.ds(off, chunk)]                    # (3, chunk)
        q = q_ref[:, pl.ds(off, chunk)]                    # (1, chunk)
        b = b_ref[:, pl.ds(off, chunk)]                    # (1, chunk) int32
        valid = (tile_start + off + lane) < n              # ragged-tail / OOB mask
        qv = jnp.where(valid, q, 0.0)                      # (1, chunk)
        rv = jnp.where(valid, r, 0.0)                      # (3, chunk)
        qr = qv * rv                                       # (3, chunk)

        if use_onehot:
            # one-hot over graphs, contracted on the MXU along the lane axis.
            onehot = (b == graph_ids).astype(jnp.float32)  # (g_pad, chunk)
            dn = (((1,), (1,)), ((), ()))
            acc_qr = acc_qr + lax.dot_general(
                qr, onehot, dimension_numbers=dn, preferred_element_type=jnp.float32)
            acc_r = acc_r + lax.dot_general(
                rv, onehot, dimension_numbers=dn, preferred_element_type=jnp.float32)
            acc_q = acc_q + lax.dot_general(
                qv, onehot, dimension_numbers=dn, preferred_element_type=jnp.float32)
        else:
            # small-G path: masked cross-lane sums per graph (no one-hot, no MXU).
            for g in range(num_graphs):
                m = (b == g)                               # (1, chunk)
                s_qr = jnp.sum(jnp.where(m, qr, 0.0), axis=1, keepdims=True)  # (3,1)
                s_r = jnp.sum(jnp.where(m, rv, 0.0), axis=1, keepdims=True)   # (3,1)
                s_q = jnp.sum(jnp.where(m, qv, 0.0), axis=1, keepdims=True)   # (1,1)
                acc_qr = acc_qr + jnp.where(gid3 == g, s_qr, 0.0)
                acc_r = acc_r + jnp.where(gid3 == g, s_r, 0.0)
                acc_q = acc_q + jnp.where(gid1 == g, s_q, 0.0)
        return acc_qr, acc_r, acc_q

    init = (jnp.zeros((3, g_pad), jnp.float32),
            jnp.zeros((3, g_pad), jnp.float32),
            jnp.zeros((1, g_pad), jnp.float32))
    acc_qr, acc_r, acc_q = lax.fori_loop(0, tile_n // chunk, body, init)

    # output blocks are resident across the (arbitrary) tile axis -> accumulate in place.
    qr_ref[...] += acc_qr
    rs_ref[...] += acc_r
    qs_ref[...] += acc_q


@functools.partial(
    jax.jit,
    static_argnames=("num_graphs", "remove_mean", "tile_n", "num_splits", "chunk"))
def polarization(positions, charges, batch, *, num_graphs, remove_mean=True,
                 tile_n=None, num_splits=None, chunk=512):
    """positions: (N,3); charges: (N,) or (N,1); batch: (N,) ints in [0,num_graphs) or
    None -> polarization (num_graphs, 3).  Out-of-range batch ids are dropped
    (same as jax segment_sum)."""
    r = positions.astype(jnp.float32)
    n, d = r.shape
    assert d == 3, "r dimension error"
    assert n >= 1, "need at least one node"
    q = charges.reshape(-1).astype(jnp.float32)
    assert q.shape[0] == n, "q dimension error"
    if batch is None:
        b = jnp.zeros((n,), dtype=jnp.int32)
    else:
        b = batch.astype(jnp.int32)
    # TODO(synk): int16/int8 batch ids would shave ~10% HBM traffic on this path.

    if num_splits is None:
        num_splits = _default_num_splits()
    use_onehot = num_graphs > 8
    g_pad = _round_up(max(num_graphs, 1), 128)

    if tile_n is None:
        tile_n = 32768                       # big tiles: amortise ~0.35us/step overhead
    tile_n = min(tile_n, _round_up(n, chunk))
    tile_n = max(chunk, _round_up(tile_n, chunk))

    # only a tiny (<= chunk-1 node) alignment pad; the ragged tail is masked in-kernel.
    n_padded = _round_up(n, chunk)
    pad = n_padded - n
    # lane-dense repack: nodes on the 128-lane axis.
    # TODO(synk): the (N,3)->(3,N) transpose is an extra strided copy; callers that can
    #             keep positions lane-major should pass them pre-transposed.
    r_t = jnp.pad(r, ((0, pad), (0, 0))).T               # (3, n_padded)
    q_t = jnp.pad(q, (0, pad))[None, :]                  # (1, n_padded)
    b_t = jnp.pad(b, (0, pad))[None, :]                  # (1, n_padded)

    n_tiles = -(-n_padded // tile_n)
    num_splits = max(1, min(num_splits, n_tiles))
    tiles_per_split = -(-n_tiles // num_splits)
    last_block = n_tiles - 1

    n_arr = jnp.array([n], dtype=jnp.int32)

    def node_map(s, t):
        # clamp so over-provisioned (split-rounding) steps re-read a valid block;
        # their contribution is zeroed by the in-kernel index mask.
        return (0, jnp.minimum(s * tiles_per_split + t, last_block))

    kernel = functools.partial(
        _polarization_kernel, tiles_per_split=tiles_per_split, tile_n=tile_n,
        chunk=chunk, num_graphs=num_graphs, use_onehot=use_onehot)

    bytes_accessed = 5 * 4 * n_padded + num_splits * 7 * g_pad * 4
    flops = n_padded * ((15 * g_pad + 16) if use_onehot else (24 * num_graphs + 16))

    out_qr, out_r, out_q = pl.pallas_call(
        kernel,
        out_shape=(jax.ShapeDtypeStruct((num_splits, 3, g_pad), jnp.float32),
                   jax.ShapeDtypeStruct((num_splits, 3, g_pad), jnp.float32),
                   jax.ShapeDtypeStruct((num_splits, 1, g_pad), jnp.float32)),
        grid=(num_splits, tiles_per_split),
        in_specs=[
            pl.BlockSpec(memory_space=pltpu.MemorySpace.SMEM),   # true node count
            pl.BlockSpec((3, tile_n), node_map),                 # r (lane-dense)
            pl.BlockSpec((1, tile_n), node_map),                 # q
            pl.BlockSpec((1, tile_n), node_map),                 # batch ids
        ],
        out_specs=(pl.BlockSpec((None, 3, g_pad), lambda s, t: (s, 0, 0)),
                   pl.BlockSpec((None, 3, g_pad), lambda s, t: (s, 0, 0)),
                   pl.BlockSpec((None, 1, g_pad), lambda s, t: (s, 0, 0))),
        compiler_params=pltpu.CompilerParams(
            dimension_semantics=("parallel", "arbitrary"),
            vmem_limit_bytes=32 * 1024 * 1024),
        cost_estimate=pl.CostEstimate(flops=int(flops), transcendentals=0,
                                      bytes_accessed=int(bytes_accessed)),
    )(n_arr, r_t, q_t, b_t)

    sum_qr = jnp.sum(out_qr, axis=0)[:, :num_graphs]     # (3, G): sum q_i * r_i
    if remove_mean:
        sum_r = jnp.sum(out_r, axis=0)[:, :num_graphs]   # (3, G): sum r_i
        total_q = jnp.sum(out_q)                         # global sum q (valid ids)
        q_mean = total_q / jnp.float32(max(n, 1))
        pol = sum_qr - q_mean * sum_r
    else:
        pol = sum_qr
    return pol.T                                          # (G, 3)


if __name__ == "__main__":
    key = jax.random.PRNGKey(0)
    k1, k2, k3, k4, k5, k6 = jax.random.split(key, 6)

    # ---- test 1: tiny input, 2 graphs -> masked cross-lane-sum path ----
    n1, g1 = 8, 2
    pos1 = jax.random.normal(k1, (n1, 3), dtype=jnp.float32)
    q1 = jax.random.normal(k2, (n1,), dtype=jnp.float32)
    b1 = jnp.array([0, 0, 0, 0, 1, 1, 1, 1], dtype=jnp.int32)

    pol1 = jax.block_until_ready(polarization(pos1, q1, b1, num_graphs=g1))
    ref1 = jax.ops.segment_sum((q1 - jnp.mean(q1))[:, None] * pos1, b1,
                               num_segments=g1)
    assert pol1.shape == (g1, 3)
    assert jnp.allclose(pol1, ref1, atol=1e-4, rtol=1e-4), (pol1, ref1)

    pol1_nm = jax.block_until_ready(
        polarization(pos1, q1, b1, num_graphs=g1, remove_mean=False))
    ref1_nm = jax.ops.segment_sum(q1[:, None] * pos1, b1, num_segments=g1)
    assert jnp.allclose(pol1_nm, ref1_nm, atol=1e-4, rtol=1e-4), (pol1_nm, ref1_nm)

    # ---- test 2: 40 graphs -> one-hot / MXU path ----
    n2, g2 = 120, 40
    pos2 = jax.random.normal(k3, (n2, 3), dtype=jnp.float32)
    q2 = jax.random.normal(k4, (n2,), dtype=jnp.float32)
    b2 = jnp.repeat(jnp.arange(g2, dtype=jnp.int32), 3)

    pol2 = jax.block_until_ready(polarization(pos2, q2, b2, num_graphs=g2))
    ref2 = jax.ops.segment_sum((q2 - jnp.mean(q2))[:, None] * pos2, b2,
                               num_segments=g2)
    assert pol2.shape == (g2, 3)
    assert jnp.allclose(pol2, ref2, atol=1e-4, rtol=1e-4), (pol2, ref2)

    # ---- test 3: ragged node count, multiple tiles, partial last block + split clamp ----
    n3, g3 = 1100, 3
    pos3 = jax.random.normal(k5, (n3, 3), dtype=jnp.float32)
    q3 = jax.random.normal(k6, (n3,), dtype=jnp.float32)
    b3 = jnp.concatenate([jnp.full((400,), 0, jnp.int32),
                          jnp.full((350,), 1, jnp.int32),
                          jnp.full((350,), 2, jnp.int32)])
    ref3 = jax.ops.segment_sum((q3 - jnp.mean(q3))[:, None] * pos3, b3,
                               num_segments=g3)
    pol3a = jax.block_until_ready(
        polarization(pos3, q3, b3, num_graphs=g3, tile_n=1024, num_splits=2))
    assert jnp.allclose(pol3a, ref3, atol=2e-3, rtol=2e-3), (pol3a, ref3)
    pol3b = jax.block_until_ready(
        polarization(pos3, q3, b3, num_graphs=g3, tile_n=512, num_splits=2))
    assert jnp.allclose(pol3b, ref3, atol=2e-3, rtol=2e-3), (pol3b, ref3)

    # ---- batch=None path (single graph) ----
    pol4 = jax.block_until_ready(polarization(pos1, q1, None, num_graphs=1))
    ref4 = jnp.sum((q1 - jnp.mean(q1))[:, None] * pos1, axis=0, keepdims=True)
    assert jnp.allclose(pol4, ref4, atol=1e-4, rtol=1e-4), (pol4, ref4)

    print("KERNEL_OK")
</pallas_src>

<mosaic_0001>
module attributes {stable_mosaic.version = 11 : i64} {
  func.func @_polarization_kernel(%arg0: i32, %arg1: i32, %arg2: memref<1xi32, #tpu.memory_space<smem>>, %arg3: memref<3x512xf32, #tpu.memory_space<vmem>>, %arg4: memref<1x512xf32, #tpu.memory_space<vmem>>, %arg5: memref<1x512xi32, #tpu.memory_space<vmem>>, %arg6: memref<1x3x128xf32, #tpu.memory_space<vmem>>, %arg7: memref<1x3x128xf32, #tpu.memory_space<vmem>>, %arg8: memref<1x1x128xf32, #tpu.memory_space<vmem>>) attributes {dimension_semantics = [#tpu.dimension_semantics<parallel>, #tpu.dimension_semantics<arbitrary>], iteration_bounds = array<i64: 1, 1>, scalar_prefetch = 0 : i64, scratch_operands = 0 : i64, tpu.core_type = #tpu.core_type<tc>, window_params = [{transform_indices = @transform_0, window_bounds = array<i64: 1>}, {transform_indices = @transform_1, window_bounds = array<i64: 3, 512>}, {transform_indices = @transform_2, window_bounds = array<i64: 1, 512>}, {transform_indices = @transform_3, window_bounds = array<i64: 1, 512>}, {transform_indices = @transform_4, window_bounds = array<i64: 1, 3, 128>}, {transform_indices = @transform_5, window_bounds = array<i64: 1, 3, 128>}, {transform_indices = @transform_6, window_bounds = array<i64: 1, 1, 128>}]} {
    %c0_i32 = arith.constant 0 : i32
    %0 = arith.cmpi eq, %arg1, %c0_i32 : i32
    %1 = arith.extui %0 : i1 to i32
    %c0_i32_0 = arith.constant 0 : i32
    %2 = arith.cmpi ne, %1, %c0_i32_0 : i32
    scf.if %2 {
      %cst_55 = arith.constant 0.000000e+00 : f32
      %130 = vector.broadcast %cst_55 : f32 to vector<3x128xf32>
      %c0_56 = arith.constant 0 : index
      %c0_57 = arith.constant 0 : index
      %c0_58 = arith.constant 0 : index
      %131 = vector.load %arg6[%c0_56, %c0_57, %c0_58] : memref<1x3x128xf32, #tpu.memory_space<vmem>>, vector<1x3x128xf32>
      %132 = vector.shape_cast %131 : vector<1x3x128xf32> to vector<3x128xf32>
      %133 = vector.shape_cast %130 : vector<3x128xf32> to vector<1x3x128xf32>
      tpu.vector_store %arg6[%c0_56, %c0_57, %c0_58], %133 {strides = array<i32>} : memref<1x3x128xf32, #tpu.memory_space<vmem>>, vector<1x3x128xf32>,
      %cst_59 = arith.constant 0.000000e+00 : f32
      %134 = vector.broadcast %cst_59 : f32 to vector<3x128xf32>
      %c0_60 = arith.constant 0 : index
      %c0_61 = arith.constant 0 : index
      %c0_62 = arith.constant 0 : index
      %135 = vector.load %arg7[%c0_60, %c0_61, %c0_62] : memref<1x3x128xf32, #tpu.memory_space<vmem>>, vector<1x3x128xf32>
      %136 = vector.shape_cast %135 : vector<1x3x128xf32> to vector<3x128xf32>
      %137 = vector.shape_cast %134 : vector<3x128xf32> to vector<1x3x128xf32>
      tpu.vector_store %arg7[%c0_60, %c0_61, %c0_62], %137 {strides = array<i32>} : memref<1x3x128xf32, #tpu.memory_space<vmem>>, vector<1x3x128xf32>,
      %cst_63 = arith.constant 0.000000e+00 : f32
      %138 = vector.broadcast %cst_63 : f32 to vector<1x128xf32>
      %c0_64 = arith.constant 0 : index
      %c0_65 = arith.constant 0 : index
      %c0_66 = arith.constant 0 : index
      %139 = vector.load %arg8[%c0_64, %c0_65, %c0_66] : memref<1x1x128xf32, #tpu.memory_space<vmem>>, vector<1x1x128xf32>
      %140 = vector.shape_cast %139 : vector<1x1x128xf32> to vector<1x128xf32>
      %141 = vector.shape_cast %138 : vector<1x128xf32> to vector<1x1x128xf32>
      tpu.vector_store %arg8[%c0_64, %c0_65, %c0_66], %141 {strides = array<i32>} : memref<1x1x128xf32, #tpu.memory_space<vmem>>, vector<1x1x128xf32>,
    } else {
    }
    %c0 = arith.constant 0 : index
    %3 = memref.load %arg2[%c0] : memref<1xi32, #tpu.memory_space<smem>>
    %c1_i32 = arith.constant 1 : i32
    %4 = arith.muli %arg0, %c1_i32 : i32
    %5 = arith.addi %4, %arg1 : i32
    %c512_i32 = arith.constant 512 : i32
    %6 = arith.muli %5, %c512_i32 : i32
    %7 = tpu.iota {dimensions = array<i32: 1>} : vector<1x512xi32>
    %8 = tpu.iota {dimensions = array<i32: 1>} : vector<3x128xi32>
    %9 = tpu.iota {dimensions = array<i32: 1>} : vector<1x128xi32>
    %cst = arith.constant 0.000000e+00 : f32
    %10 = vector.broadcast %cst : f32 to vector<3x128xf32>
    %cst_1 = arith.constant 0.000000e+00 : f32
    %11 = vector.broadcast %cst_1 : f32 to vector<3x128xf32>
    %cst_2 = arith.constant 0.000000e+00 : f32
    %12 = vector.broadcast %cst_2 : f32 to vector<1x128xf32>
    %c0_i32_3 = arith.constant 0 : i32
    %c512_i32_4 = arith.constant 512 : i32
    %13 = arith.muli %c0_i32_3, %c512_i32_4 : i32
    %14 = tpu.assume_multiple %13, 512 : i32
    %c0_5 = arith.constant 0 : index
    %15 = arith.index_cast %14 : i32 to index
    %16 = vector.load %arg3[%c0_5, %15] : memref<3x512xf32, #tpu.memory_space<vmem>>, vector<3x512xf32>
    %c0_6 = arith.constant 0 : index
    %17 = arith.index_cast %14 : i32 to index
    %18 = vector.load %arg4[%c0_6, %17] : memref<1x512xf32, #tpu.memory_space<vmem>>, vector<1x512xf32>
    %c0_7 = arith.constant 0 : index
    %19 = arith.index_cast %14 : i32 to index
    %20 = vector.load %arg5[%c0_7, %19] : memref<1x512xi32, #tpu.memory_space<vmem>>, vector<1x512xi32>
    %21 = arith.addi %6, %14 : i32
    %22 = vector.broadcast %21 : i32 to vector<1x512xi32>
    %23 = arith.addi %22, %7 : vector<1x512xi32>
    %24 = vector.broadcast %3 : i32 to vector<1x512xi32>
    %25 = arith.cmpi slt, %23, %24 : vector<1x512xi32>
    %cst_8 = arith.constant 0.000000e+00 : f32
    %26 = vector.broadcast %cst_8 : f32 to vector<1x512xf32>
    %27 = arith.select %25, %18, %26 : vector<1x512xi1>, vector<1x512xf32>
    %cst_9 = arith.constant 0.000000e+00 : f32
    %28 = vector.shape_cast %25 : vector<1x512xi1> to vector<1x512xi1>
    %29 = vector.broadcast %28 : vector<1x512xi1> to vector<3x512xi1>
    %30 = vector.broadcast %cst_9 : f32 to vector<3x512xf32>
    %31 = arith.select %29, %16, %30 : vector<3x512xi1>, vector<3x512xf32>
    %32 = vector.broadcast %27 : vector<1x512xf32> to vector<3x512xf32>
    %33 = arith.mulf %32, %31 : vector<3x512xf32>
    %c0_i32_10 = arith.constant 0 : i32
    %34 = vector.broadcast %c0_i32_10 : i32 to vector<1x512xi32>
    %35 = arith.cmpi eq, %20, %34 : vector<1x512xi32>
    %cst_11 = arith.constant 0.000000e+00 : f32
    %36 = vector.shape_cast %35 : vector<1x512xi1> to vector<1x512xi1>
    %37 = vector.broadcast %36 : vector<1x512xi1> to vector<3x512xi1>
    %38 = vector.broadcast %cst_11 : f32 to vector<3x512xf32>
    %39 = arith.select %37, %33, %38 : vector<3x512xi1>, vector<3x512xf32>
    %cst_12 = arith.constant dense<0.000000e+00> : vector<3xf32>
    %40 = vector.multi_reduction <add>, %39, %cst_12 [1] : vector<3x512xf32> to vector<3xf32>
    %41 = vector.shape_cast %40 : vector<3xf32> to vector<3x1xf32>
    %cst_13 = arith.constant 0.000000e+00 : f32
    %42 = vector.shape_cast %35 : vector<1x512xi1> to vector<1x512xi1>
    %43 = vector.broadcast %42 : vector<1x512xi1> to vector<3x512xi1>
    %44 = vector.broadcast %cst_13 : f32 to vector<3x512xf32>
    %45 = arith.select %43, %31, %44 : vector<3x512xi1>, vector<3x512xf32>
    %cst_14 = arith.constant dense<0.000000e+00> : vector<3xf32>
    %46 = vector.multi_reduction <add>, %45, %cst_14 [1] : vector<3x512xf32> to vector<3xf32>
    %47 = vector.shape_cast %46 : vector<3xf32> to vector<3x1xf32>
    %cst_15 = arith.constant 0.000000e+00 : f32
    %48 = vector.broadcast %cst_15 : f32 to vector<1x512xf32>
    %49 = arith.select %35, %27, %48 : vector<1x512xi1>, vector<1x512xf32>
    %cst_16 = arith.constant dense<0.000000e+00> : vector<1xf32>
    %50 = vector.multi_reduction <add>, %49, %cst_16 [1] : vector<1x512xf32> to vector<1xf32>
    %51 = vector.shape_cast %50 : vector<1xf32> to vector<1x1xf32>
    %c0_i32_17 = arith.constant 0 : i32
    %52 = vector.broadcast %c0_i32_17 : i32 to vector<3x128xi32>
    %53 = arith.cmpi eq, %8, %52 : vector<3x128xi32>
    %cst_18 = arith.constant 0.000000e+00 : f32
    %54 = vector.shape_cast %41 : vector<3x1xf32> to vector<3x1xf32>
    %55 = vector.broadcast %54 : vector<3x1xf32> to vector<3x128xf32>
    %56 = vector.broadcast %cst_18 : f32 to vector<3x128xf32>
    %57 = arith.select %53, %55, %56 : vector<3x128xi1>, vector<3x128xf32>
    %58 = arith.addf %10, %57 : vector<3x128xf32>
    %c0_i32_19 = arith.constant 0 : i32
    %59 = vector.broadcast %c0_i32_19 : i32 to vector<3x128xi32>
    %60 = arith.cmpi eq, %8, %59 : vector<3x128xi32>
    %cst_20 = arith.constant 0.000000e+00 : f32
    %61 = vector.shape_cast %47 : vector<3x1xf32> to vector<3x1xf32>
    %62 = vector.broadcast %61 : vector<3x1xf32> to vector<3x128xf32>
    %63 = vector.broadcast %cst_20 : f32 to vector<3x128xf32>
    %64 = arith.select %60, %62, %63 : vector<3x128xi1>, vector<3x128xf32>
    %65 = arith.addf %11, %64 : vector<3x128xf32>
    %c0_i32_21 = arith.constant 0 : i32
    %66 = vector.broadcast %c0_i32_21 : i32 to vector<1x128xi32>
    %67 = arith.cmpi eq, %9, %66 : vector<1x128xi32>
    %cst_22 = arith.constant 0.000000e+00 : f32
    %68 = vector.shape_cast %51 : vector<1x1xf32> to vector<1x1xf32>
    %69 = vector.broadcast %68 : vector<1x1xf32> to vector<1x128xf32>
    %70 = vector.broadcast %cst_22 : f32 to vector<1x128xf32>
    %71 = arith.select %67, %69, %70 : vector<1x128xi1>, vector<1x128xf32>
    %72 = arith.addf %12, %71 : vector<1x128xf32>
    %c1_i32_23 = arith.constant 1 : i32
    %73 = vector.broadcast %c1_i32_23 : i32 to vector<1x512xi32>
    %74 = arith.cmpi eq, %20, %73 : vector<1x512xi32>
    %cst_24 = arith.constant 0.000000e+00 : f32
    %75 = vector.shape_cast %74 : vector<1x512xi1> to vector<1x512xi1>
    %76 = vector.broadcast %75 : vector<1x512xi1> to vector<3x512xi1>
    %77 = vector.broadcast %cst_24 : f32 to vector<3x512xf32>
    %78 = arith.select %76, %33, %77 : vector<3x512xi1>, vector<3x512xf32>
    %cst_25 = arith.constant dense<0.000000e+00> : vector<3xf32>
    %79 = vector.multi_reduction <add>, %78, %cst_25 [1] : vector<3x512xf32> to vector<3xf32>
    %80 = vector.shape_cast %79 : vector<3xf32> to vector<3x1xf32>
    %cst_26 = arith.constant 0.000000e+00 : f32
    %81 = vector.shape_cast %74 : vector<1x512xi1> to vector<1x512xi1>
    %82 = vector.broadcast %81 : vector<1x512xi1> to vector<3x512xi1>
    %83 = vector.broadcast %cst_26 : f32 to vector<3x512xf32>
    %84 = arith.select %82, %31, %83 : vector<3x512xi1>, vector<3x512xf32>
    %cst_27 = arith.constant dense<0.000000e+00> : vector<3xf32>
    %85 = vector.multi_reduction <add>, %84, %cst_27 [1] : vector<3x512xf32> to vector<3xf32>
    %86 = vector.shape_cast %85 : vector<3xf32> to vector<3x1xf32>
    %cst_28 = arith.constant 0.000000e+00 : f32
    %87 = vector.broadcast %cst_28 : f32 to vector<1x512xf32>
    %88 = arith.select %74, %27, %87 : vector<1x512xi1>, vector<1x512xf32>
    %cst_29 = arith.constant dense<0.000000e+00> : vector<1xf32>
    %89 = vector.multi_reduction <add>, %88, %cst_29 [1] : vector<1x512xf32> to vector<1xf32>
    %90 = vector.shape_cast %89 : vector<1xf32> to vector<1x1xf32>
    %c1_i32_30 = arith.constant 1 : i32
    %91 = vector.broadcast %c1_i32_30 : i32 to vector<3x128xi32>
    %92 = arith.cmpi eq, %8, %91 : vector<3x128xi32>
    %cst_31 = arith.constant 0.000000e+00 : f32
    %93 = vector.shape_cast %80 : vector<3x1xf32> to vector<3x1xf32>
    %94 = vector.broadcast %93 : vector<3x1xf32> to vector<3x128xf32>
    %95 = vector.broadcast %cst_31 : f32 to vector<3x128xf32>
    %96 = arith.select %92, %94, %95 : vector<3x128xi1>, vector<3x128xf32>
    %97 = arith.addf %58, %96 : vector<3x128xf32>
    %c1_i32_32 = arith.constant 1 : i32
    %98 = vector.broadcast %c1_i32_32 : i32 to vector<3x128xi32>
    %99 = arith.cmpi eq, %8, %98 : vector<3x128xi32>
    %cst_33 = arith.constant 0.000000e+00 : f32
    %100 = vector.shape_cast %86 : vector<3x1xf32> to vector<3x1xf32>
    %101 = vector.broadcast %100 : vector<3x1xf32> to vector<3x128xf32>
    %102 = vector.broadcast %cst_33 : f32 to vector<3x128xf32>
    %103 = arith.select %99, %101, %102 : vector<3x128xi1>, vector<3x128xf32>
    %104 = arith.addf %65, %103 : vector<3x128xf32>
    %c1_i32_34 = arith.constant 1 : i32
    %105 = vector.broadcast %c1_i32_34 : i32 to vector<1x128xi32>
    %106 = arith.cmpi eq, %9, %105 : vector<1x128xi32>
    %cst_35 = arith.constant 0.000000e+00 : f32
    %107 = vector.shape_cast %90 : vector<1x1xf32> to vector<1x1xf32>
    %108 = vector.broadcast %107 : vector<1x1xf32> to vector<1x128xf32>
    %109 = vector.broadcast %cst_35 : f32 to vector<1x128xf32>
    %110 = arith.select %106, %108, %109 : vector<1x128xi1>, vector<1x128xf32>
    %111 = arith.addf %72, %110 : vector<1x128xf32>
    %c1_i32_36 = arith.constant 1 : i32
    %c0_37 = arith.constant 0 : index
    %c0_38 = arith.constant 0 : index
    %c0_39 = arith.constant 0 : index
    %112 = vector.load %arg6[%c0_37, %c0_38, %c0_39] : memref<1x3x128xf32, #tpu.memory_space<vmem>>, vector<1x3x128xf32>
    %113 = vector.shape_cast %112 : vector<1x3x128xf32> to vector<3x128xf32>
    %114 = arith.addf %113, %97 : vector<3x128xf32>
    %c0_40 = arith.constant 0 : index
    %c0_41 = arith.constant 0 : index
    %c0_42 = arith.constant 0 : index
    %115 = vector.load %arg6[%c0_40, %c0_41, %c0_42] : memref<1x3x128xf32, #tpu.memory_space<vmem>>, vector<1x3x128xf32>
    %116 = vector.shape_cast %115 : vector<1x3x128xf32> to vector<3x128xf32>
    %117 = vector.shape_cast %114 : vector<3x128xf32> to vector<1x3x128xf32>
    tpu.vector_store %arg6[%c0_40, %c0_41, %c0_42], %117 {strides = array<i32>} : memref<1x3x128xf32, #tpu.memory_space<vmem>>, vector<1x3x128xf32>,
    %c0_43 = arith.constant 0 : index
    %c0_44 = arith.constant 0 : index
    %c0_45 = arith.constant 0 : index
    %118 = vector.load %arg7[%c0_43, %c0_44, %c0_45] : memref<1x3x128xf32, #tpu.memory_space<vmem>>, vector<1x3x128xf32>
    %119 = vector.shape_cast %118 : vector<1x3x128xf32> to vector<3x128xf32>
    %120 = arith.addf %119, %104 : vector<3x128xf32>
    %c0_46 = arith.constant 0 : index
    %c0_47 = arith.constant 0 : index
    %c0_48 = arith.constant 0 : index
    %121 = vector.load %arg7[%c0_46, %c0_47, %c0_48] : memref<1x3x128xf32, #tpu.memory_space<vmem>>, vector<1x3x128xf32>
    %122 = vector.shape_cast %121 : vector<1x3x128xf32> to vector<3x128xf32>
    %123 = vector.shape_cast %120 : vector<3x128xf32> to vector<1x3x128xf32>
    tpu.vector_store %arg7[%c0_46, %c0_47, %c0_48], %123 {strides = array<i32>} : memref<1x3x128xf32, #tpu.memory_space<vmem>>, vector<1x3x128xf32>,
    %c0_49 = arith.constant 0 : index
    %c0_50 = arith.constant 0 : index
    %c0_51 = arith.constant 0 : index
    %124 = vector.load %arg8[%c0_49, %c0_50, %c0_51] : memref<1x1x128xf32, #tpu.memory_space<vmem>>, vector<1x1x128xf32>
    %125 = vector.shape_cast %124 : vector<1x1x128xf32> to vector<1x128xf32>
    %126 = arith.addf %125, %111 : vector<1x128xf32>
    %c0_52 = arith.constant 0 : index
    %c0_53 = arith.constant 0 : index
    %c0_54 = arith.constant 0 : index
    %127 = vector.load %arg8[%c0_52, %c0_53, %c0_54] : memref<1x1x128xf32, #tpu.memory_space<vmem>>, vector<1x1x128xf32>
    %128 = vector.shape_cast %127 : vector<1x1x128xf32> to vector<1x128xf32>
    %129 = vector.shape_cast %126 : vector<1x128xf32> to vector<1x1x128xf32>
    tpu.vector_store %arg8[%c0_52, %c0_53, %c0_54], %129 {strides = array<i32>} : memref<1x1x128xf32, #tpu.memory_space<vmem>>, vector<1x1x128xf32>,
    return
  }
  func.func @transform_0(%arg0: i32, %arg1: i32) -> i32 {
    %c0_i32 = arith.constant 0 : i32
    %c0_i32_0 = arith.constant 0 : i32
    return %c0_i32 : i32
  }
  func.func @transform_1(%arg0: i32, %arg1: i32) -> (i32, i32) {
    %c1_i32 = arith.constant 1 : i32
    %0 = arith.muli %arg0, %c1_i32 : i32
    %1 = arith.addi %0, %arg1 : i32
    %c0_i32 = arith.constant 0 : i32
    %2 = arith.minsi %1, %c0_i32 : i32
    %c0_i32_0 = arith.constant 0 : i32
    %c0_i32_1 = arith.constant 0 : i32
    return %c0_i32_0, %2 : i32, i32
  }
  func.func @transform_2(%arg0: i32, %arg1: i32) -> (i32, i32) {
    %c1_i32 = arith.constant 1 : i32
    %0 = arith.muli %arg0, %c1_i32 : i32
    %1 = arith.addi %0, %arg1 : i32
    %c0_i32 = arith.constant 0 : i32
    %2 = arith.minsi %1, %c0_i32 : i32
    %c0_i32_0 = arith.constant 0 : i32
    %c0_i32_1 = arith.constant 0 : i32
    return %c0_i32_0, %2 : i32, i32
  }
  func.func @transform_3(%arg0: i32, %arg1: i32) -> (i32, i32) {
    %c1_i32 = arith.constant 1 : i32
    %0 = arith.muli %arg0, %c1_i32 : i32
    %1 = arith.addi %0, %arg1 : i32
    %c0_i32 = arith.constant 0 : i32
    %2 = arith.minsi %1, %c0_i32 : i32
    %c0_i32_0 = arith.constant 0 : i32
    %c0_i32_1 = arith.constant 0 : i32
    return %c0_i32_0, %2 : i32, i32
  }
  func.func @transform_4(%arg0: i32, %arg1: i32) -> (i32, i32, i32) {
    %c0_i32 = arith.constant 0 : i32
    %c0_i32_0 = arith.constant 0 : i32
    %c0_i32_1 = arith.constant 0 : i32
    return %arg0, %c0_i32, %c0_i32_0 : i32, i32, i32
  }
  func.func @transform_5(%arg0: i32, %arg1: i32) -> (i32, i32, i32) {
    %c0_i32 = arith.constant 0 : i32
    %c0_i32_0 = arith.constant 0 : i32
    %c0_i32_1 = arith.constant 0 : i32
    return %arg0, %c0_i32, %c0_i32_0 : i32, i32, i32
  }
  func.func @transform_6(%arg0: i32, %arg1: i32) -> (i32, i32, i32) {
    %c0_i32 = arith.constant 0 : i32
    %c0_i32_0 = arith.constant 0 : i32
    %c0_i32_1 = arith.constant 0 : i32
    return %arg0, %c0_i32, %c0_i32_0 : i32, i32, i32
  }
}

</mosaic_0001>

<bundles_post_ra>
// kernel: polarization.1
= control target key start
LH: loop header
LB: loop body
LE: loop exit
PB: predicated region body
PF: predicated region fallthrough
CT: control target
= control target key end

     0   :  { %v121_v0 = vlaneseq  ;;  %v445_v4 = vmov 1966171168   ;;  %vm230_vm0 = vcmask 1042432   ;;  %v446_v28 = vmov 0   ;;  %s701_s0 = inlined_call_operand.<no memory space> [shape: s32[1], index: 0, kind: input, shape index: {}]   ;;  %s702_s1 = inlined_call_operand.vmem [shape: f32[3,512], index: 1, kind: input, shape index: {}]   ;;  %s703_s3 = inlined_call_operand.vmem [shape: s32[1,512], index: 3, kind: input, shape index: {}]   ;;  %s704_s2 = inlined_call_operand.vmem [shape: f32[1,512], index: 2, kind: input, shape index: {}]   ;;  %s705_s4 = inlined_call_operand.vmem [shape: f32[1,3,128], index: 4, kind: output, shape index: {0}]   ;;  %s706_s5 = inlined_call_operand.vmem [shape: f32[1,3,128], index: 5, kind: output, shape index: {1}]   ;;  %s707_s6 = inlined_call_operand.vmem [shape: f32[1,1,128], index: 6, kind: output, shape index: {2}]  }
   0x1   :  { %v126_v1 = vld [vmem:[%s702_s1] sm:$0x77]  ;;  %v127_v2 = vld [vmem:[%s702_s1 + $0x8] sm:$0x77]  ;;  %v136_v3 = vstv %s701_s0  ;;  %v260_v5 = vunpack.c.l.s4 %v445_v4  ;;  %vm304_vm15 = vcmask 1040384  }
   0x2   :  { %v492_v6 = vand.u32 127, %v121_v0  ;;  %v497_v7 = vld [vmem:[%s703_s3] sm:$0xf]  ;;  %v143_v8 = vshrl.u32 %v121_v0, 7  ;;  %v176_v9 = vcombine.high %v126_v1, %v126_v1  ;;  %v177_v10 = vcombine.high %v127_v2, %v127_v2 }
   0x3   :  { %vm204_vm1 = vcmp.eq.s32.totalorder %v497_v7, 0  ;;  %v261_v11 = vunpack.c.0.s8 %v260_v5  ;;  %v128_v15 = vld [vmem:[%s704_s2] sm:$0xf]  ;;  %vm321_vm6 = vcmp.eq.s32.totalorder %v497_v7, 1 }
   0x4   :  { %v123_v12 = vadd.s32 128, %v492_v6  ;;  %v124_v13 = vadd.s32 256, %v492_v6  ;;  %v125_v14 = vadd.s32 384, %v492_v6  ;;  %vm137_vm2 = vcmp.lt.s32.totalorder %v492_v6, %v136_v3 }
   0x5   :  { %v507_v16 = vsub.s32 0, %v143_v8  ;;  %v509_v17 = vsub.s32 1, %v143_v8  ;;  %v511_v18 = vsub.s32 2, %v143_v8  ;;  %v513_v19 = vsub.s32 3, %v143_v8 }
   0x6   :  { %vm138_vm3 = vcmp.lt.s32.totalorder %v123_v12, %v136_v3  ;;  %vm139_vm4 = vcmp.lt.s32.totalorder %v124_v13, %v136_v3  ;;  %vm140_vm5 = vcmp.lt.s32.totalorder %v125_v14, %v136_v3  ;;  %v517_v20 = vsel %vm137_vm2, %v126_v1, 0.0 }
   0x7   :  { %v145_v21 = vrot.slane %v128_v15, %v507_v16  ;;  %v149_v22 = vrot.slane %v128_v15, %v509_v17  ;;  %v153_v23 = vrot.slane %v128_v15, %v511_v18  ;;  %v157_v24 = vrot.slane %v128_v15, %v513_v19 }
   0x8   :  { %v524_v25 = vsel %vm138_vm3, %v176_v9, 0.0  ;;  %v526_v26 = vsel %vm139_vm4, %v127_v2, 0.0  ;;  %v528_v27 = vsel %vm140_vm5, %v177_v10, 0.0  ;;  %v205_v29 = vsel %vm204_vm1, 1, %v446_v28 }
   0x9   :  { %v163_v30 = vsel %vm138_vm3, %v149_v22, 0.0  ;;  %v164_v31 = vsel %vm139_vm4, %v153_v23, 0.0  ;;  %v165_v32 = vsel %vm140_vm5, %v157_v24, 0.0  ;;  %v209_v33 = vrot.slane %v205_v29, %v507_v16 }
   0xa   :  { %v191_v34 = vrot.slane %v163_v30, %v507_v16  ;;  %v195_v35 = vrot.slane %v164_v31, %v507_v16  ;;  %v199_v36 = vrot.slane %v165_v32, %v507_v16  ;;  %v213_v37 = vrot.slane %v205_v29, %v509_v17 }
   0xb   :  { %v217_v38 = vrot.slane %v205_v29, %v511_v18  ;;  %v221_v39 = vrot.slane %v205_v29, %v513_v19  ;;  %vm539_vm7 = vcmp.eq.s32.totalorder %v209_v33, 1  ;;  %v258_v41 = vcombine.low %v164_v31, %v165_v32 }
   0xc   :  { %vm543_vm8 = vcmp.eq.s32.totalorder %v213_v37, 1  ;;  %v240_v43 = vsel %vm539_vm7, %v517_v20, 0.0  ;;  %v264_v44 = vsub.s32 %v261_v11, %v143_v8  ;;  %v162_v45 = vsel %vm137_vm2, %v145_v21, 0.0 }
   0xd   :  { %vm552_vm9 = vcmp.eq.s32.totalorder %v217_v38, 1  ;;  %vm556_vm10 = vcmp.eq.s32.totalorder %v221_v39, 1  ;;  %v241_v48 = vsel %vm543_vm8, %v524_v25, 0.0  ;;  %v244_v49 = vsel %vm230_vm0, %v240_v43, 0.0 }
   0xe   :  { %v242_v50 = vsel %vm552_vm9, %v526_v26, 0.0  ;;  %v243_v51 = vsel %vm556_vm10, %v528_v27, 0.0  ;;  %v245_v52 = vsel %vm230_vm0, %v241_v48, 0.0  ;;  %v272_v53 = vrot.slane %v258_v41, %v264_v44 }
   0xf   :  { %v246_v54 = vadd.f32 %v245_v52, %v244_v49  ;;  %v247_v55 = vsel %vm230_vm0, %v242_v50, 0.0  ;;  %v249_v56 = vsel %vm230_vm0, %v243_v51, 0.0  ;;  %v187_v57 = vrot.slane %v162_v45, %v507_v16 }
  0x10   :  { %v257_v58 = vcombine.low %v162_v45, %v163_v30  ;;  %v201_v59 = vmul.f32 %v191_v34, %v524_v25  ;;  %v202_v60 = vmul.f32 %v195_v35, %v526_v26  ;;  %v203_v61 = vmul.f32 %v199_v36, %v528_v27 }
  0x11   :  { %v248_v62 = vadd.f32 %v247_v55, %v246_v54  ;;  %v200_v63 = vmul.f32 %v187_v57, %v517_v20  ;;  %v322_v0 = vsel %vm321_vm6, 1, %v446_v28 }
  0x12   :  { %v265_v1 = vrot.slane %v257_v58, %v264_v44  ;;  %v227_v2 = vsel %vm543_vm8, %v201_v59, 0.0  ;;  %v228_v3 = vsel %vm552_vm9, %v202_v60, 0.0  ;;  %v229_v8 = vsel %vm556_vm10, %v203_v61, 0.0 }
  0x13   :  { %v250_v4 = vadd.f32 %v249_v56, %v248_v62  ;;  %v226_v5 = vsel %vm539_vm7, %v200_v63, 0.0  ;;  %v232_v9 = vsel %vm230_vm0, %v227_v2, 0.0  ;;  %v234_v12 = vsel %vm230_vm0, %v228_v3, 0.0 }
  0x14   :  { %v273_v10 = vcombine.low %v265_v1, %v272_v53  ;;  %v231_v11 = vsel %vm230_vm0, %v226_v5, 0.0  ;;  %v326_v13 = vrot.slane %v322_v0, %v507_v16  ;;  %v330_v15 = vrot.slane %v322_v0, %v509_v17 }
  0x15   :  { %251 = vadd.xlane.f32.xlu0 %v250_v4  ;;  %v233_v14 = vadd.f32 %v232_v9, %v231_v11  ;;  %v334_v21 = vrot.slane %v322_v0, %v511_v18  ;;  %v338_v22 = vrot.slane %v322_v0, %v513_v19  ;;  %v236_v23 = vsel %vm230_vm0, %v229_v8, 0.0 }
  0x16   :  { %vm596_vm11 = vcmp.eq.s32.totalorder %v326_v13, 1  ;;  %v280_v28 = vrot.slane %v273_v10, %v264_v44  ;;  %vm600_vm12 = vcmp.eq.s32.totalorder %v330_v15, 1  ;;  %v447_v10 = vmov 0.0  }
  0x17   :  { %v235_v29 = vadd.f32 %v234_v12, %v233_v14  ;;  %vm604_vm13 = vcmp.eq.s32.totalorder %v334_v21, 1  ;;  %vm608_vm14 = vcmp.eq.s32.totalorder %v338_v22, 1  ;;  %v343_v33 = vsel %vm596_vm11, %v200_v63, 0.0  ;;  %115 = vst [vmem:[%s705_s4] sm:$0x7] %v447_v10  ;;  %116 = vst [vmem:[%s706_s5] sm:$0x7] %v447_v10 }
  0x18   :  { %v344_v34 = vsel %vm600_vm12, %v201_v59, 0.0  ;;  %v345_v35 = vsel %vm604_vm13, %v202_v60, 0.0  ;;  %v346_v36 = vsel %vm608_vm14, %v203_v61, 0.0  ;;  %v347_v38 = vsel %vm230_vm0, %v343_v33, 0.0  ;;  %117 = vst [vmem:[%s707_s6] sm:$0x1] %v447_v10 }
  0x19   :  { %v237_v37 = vadd.f32 %v236_v23, %v235_v29  ;;  %v348_v39 = vsel %vm230_vm0, %v344_v34, 0.0  ;;  %v350_v40 = vsel %vm230_vm0, %v345_v35, 0.0  ;;  %v352_v42 = vsel %vm230_vm0, %v346_v36, 0.0 }
  0x1a   :  { %v349_v41 = vadd.f32 %v348_v39, %v347_v38  ;;  %v356_v43 = vsel %vm596_vm11, %v517_v20, 0.0  ;;  %v357_v44 = vsel %vm600_vm12, %v524_v25, 0.0  ;;  %v358_v45 = vsel %vm604_vm13, %v526_v26, 0.0 }
  0x1b   :  { %238 = vadd.xlane.f32.xlu0 %v237_v37  ;;  %v359_v46 = vsel %vm608_vm14, %v528_v27, 0.0  ;;  %v360_v47 = vsel %vm230_vm0, %v356_v43, 0.0  ;;  %v361_v48 = vsel %vm230_vm0, %v357_v44, 0.0  ;;  %v363_v20 = vsel %vm230_vm0, %v358_v45, 0.0 }
  0x1c   :  { %v351_v49 = vadd.f32 %v350_v40, %v349_v41  ;;  %v362_v50 = vadd.f32 %v361_v48, %v360_v47  ;;  %v365_v51 = vsel %vm230_vm0, %v359_v46, 0.0  ;;  %v282_v25 = vsel %vm204_vm1, %v280_v28, 0.0 }
  0x1d   :  { %v369_v26 = vsel %vm321_vm6, %v280_v28, 0.0  ;;  %v287_v27 = vrot.slane %v282_v25, %v507_v16  ;;  %v291_v54 = vrot.slane %v282_v25, %v509_v17  ;;  %v295_v55 = vrot.slane %v282_v25, %v511_v18 }
  0x1e   :  { %v353_v52 = vadd.f32 %v352_v42, %v351_v49  ;;  %v364_v53 = vadd.f32 %v363_v20, %v362_v50  ;;  %v299_v56 = vrot.slane %v282_v25, %v513_v19  ;;  %v374_v57 = vrot.slane %v369_v26, %v507_v16  ;;  %v407_v14 = vld [vmem:[%s705_s4] sm:$0x7] }
  0x1f   :  { %v378_v58 = vrot.slane %v369_v26, %v509_v17  ;;  %v305_v60 = vsel %vm304_vm15, %v287_v27, 0.0  ;;  %v306_v7 = vsel %vm304_vm15, %v291_v54, 0.0  ;;  %v382_v61 = vrot.slane %v369_v26, %v511_v18  ;;  %v410_v24 = vld [vmem:[%s706_s5] sm:$0x7] }
  0x20   :  { %354 = vadd.xlane.f32.xlu1 %v353_v52  ;;  %v366_v59 = vadd.f32 %v365_v51, %v364_v53  ;;  %v307_v62 = vadd.f32 %v306_v7, %v305_v60  ;;  %v308_v63 = vsel %vm304_vm15, %v295_v55, 0.0  ;;  %v386_v0 = vrot.slane %v369_v26, %v513_v19  ;;  %v413_v35 = vld [vmem:[%s707_s6] sm:$0x1] }
  0x21   :  { %v310_v1 = vsel %vm304_vm15, %v299_v56, 0.0  ;;  %v391_v16 = vsel %vm304_vm15, %v374_v57, 0.0  ;;  %v392_v17 = vsel %vm304_vm15, %v378_v58, 0.0  ;;  %v394_v2 = vsel %vm304_vm15, %v382_v61, 0.0 }
  0x22   :  { %367 = vadd.xlane.f32.xlu0 %v366_v59  ;;  %v309_v3 = vadd.f32 %v308_v63, %v307_v62  ;;  %v393_v4 = vadd.f32 %v392_v17, %v391_v16  ;;  %v396_v5 = vsel %vm304_vm15, %v386_v0, 0.0  ;;  %vm314_vm0 = vcmp.eq.s32.totalorder %v492_v6, 0 }
  0x23   :  { %vm400_vm1 = vcmp.eq.s32.totalorder %v492_v6, 1 }
  0x24   :  { %v311_v8 = vadd.f32 %v310_v1, %v309_v3  ;;  %v395_v18 = vadd.f32 %v394_v2, %v393_v4 }
  0x26   :  { %312 = vadd.xlane.f32.xlu1 %v311_v8  ;;  %v397_v9 = vadd.f32 %v396_v5, %v395_v18 }
  0x2a   :  { %398 = vadd.xlane.f32.xlu1 %v397_v9 }
  0xa2   :  { %v252_v19 = vpop.xlane.xlu0 %251 }
  0xa3   :  { %v317_v23 = vsel %vm314_vm0, %v252_v19, 0.0 }
  0xa8   :  { %v239_v11 = vpop.xlane.xlu0 %238 }
  0xa9   :  { %v315_v12 = vsel %vm314_vm0, %v239_v11, 0.0 }
  0xad   :  { %v355_v13 = vpop.xlane.xlu1 %354 }
  0xae   :  { %v401_v15 = vsel %vm400_vm1, %v355_v13, 0.0 }
  0xaf   :  { %v402_v21 = vadd.f32 %v401_v15, %v315_v12  ;;  %v368_v22 = vpop.xlane.xlu0 %367 }
  0xb0   :  { %v403_v28 = vsel %vm400_vm1, %v368_v22, 0.0 }
  0xb1   :  { %v408_v29 = vadd.f32 %v407_v14, %v402_v21  ;;  %v404_v30 = vadd.f32 %v403_v28, %v317_v23 }
  0xb3   :  { %409 = vst [vmem:[%s705_s4] sm:$0x7] %v408_v29  ;;  %v411_v31 = vadd.f32 %v410_v24, %v404_v30  ;;  %v313_v32 = vpop.xlane.xlu1 %312 }
  0xb4   :  { %v319_v34 = vsel %vm314_vm0, %v313_v32, 0.0 }
  0xb5   :  { %412 = vst [vmem:[%s706_s5] sm:$0x7] %v411_v31 }
  0xb7   :  { %v399_v33 = vpop.xlane.xlu1 %398 }
  0xb8   :  { %v405_v36 = vsel %vm400_vm1, %v399_v33, 0.0 }
  0xb9   :  { %v406_v37 = vadd.f32 %v405_v36, %v319_v34 }
  0xbb   :  { %v414_v38 = vadd.f32 %v413_v35, %v406_v37 }
  0xbd   :  { %415 = vst [vmem:[%s707_s6] sm:$0x1] %v414_v38 }

</bundles_post_ra>
